<compile_context>
chip_gen: v7x
topology: tpu7x:2x2x1
jax: 0.10.0
libtpu: 0.0.40
codegen_flags: <defaults>
</compile_context>

<pallas_src>
import jax
import jax.numpy as jnp
import numpy as np
from jax.experimental import pallas as pl
from jax.experimental.pallas import tpu as pltpu


def _round_up(v, m):
    return ((v + m - 1) // m) * m


def _pad2(a, rows, cols):
    r, c = a.shape
    return jnp.pad(a, ((0, rows - r), (0, cols - c)))


def _vmem_budget_and_limit():
    """Per-generation VMEM sizing: ~3/4 of physical VMEM for the tile working set
    and ~9/10 for the Mosaic scoped-vmem limit.  Falls back to the smallest
    (v7x, 64 MiB per TensorCore) budget if the query is unavailable."""
    try:
        cap = int(pltpu.get_tpu_info().vmem_capacity_bytes)
    except Exception:
        cap = 64 * 1024 * 1024
    budget = min(cap * 3 // 4, 100 * 1024 * 1024)
    limit = min(cap * 9 // 10, 112 * 1024 * 1024)
    return budget, limit


def _select_tiles(n_p, hid_p, fout_p, budget_bytes, use_mask):
    """Biggest (tm, tk) whose double-buffered stage-2/3 working set fits the
    per-generation VMEM budget.  tm is maximized first (it controls the xw1
    re-read amplification); when possible keep >= 2 row blocks so the 'parallel'
    row axis can still be sharded across v7x's two TensorCores."""
    tm_cands = [t for t in (2048, 1024, 512, 256, 128) if n_p % t == 0]
    tk_cands = [t for t in (4096, 2048, 1024, 512, 256, 128) if n_p % t == 0]
    tm_pref = [t for t in tm_cands if n_p // t >= 2] or tm_cands
    for tm in tm_pref:
        for tk in tk_cands:
            ws = (
                2 * tm * tk                          # adj int8 tiles (double buffered)
                + 2 * tk * hid_p * 2                 # xw1s bf16 tiles (stage 2)
                + 2 * tk * fout_p * 2                # hw2s bf16 tiles (stage 3)
                + (2 * tm * hid_p * 2 if use_mask else 0)   # dropout mask tiles
                + 2 * hid_p * fout_p * 2             # resident W2
                + 2 * tm * fout_p * 4                # output tiles
                + tm * hid_p * 4 + tm * fout_p * 4   # f32 accumulators
            )
            if ws <= budget_bytes:
                return tm, tk
    return tm_cands[-1], tk_cands[-1]


# ----------------------------------------------------------------------- kernels
def feature_transform_kernel(x_ref, w_ref, dinv_ref, o_ref):
    """o = dinv * (x @ W1)   (x row-blocks over the grid; W1 resident)."""
    xw = jnp.dot(x_ref[...], w_ref[...], preferred_element_type=jnp.float32)
    o_ref[...] = (xw * dinv_ref[...]).astype(o_ref.dtype)


def make_aggregate_kernel(apply_relu: bool, has_mask: bool, has_w2: bool):
    """out[i] = epilogue( dinv[i] * sum_k A_bin[i,k] @ xw[k] + b )

    A_bin is streamed as exact 0/1 int8 and cast to bf16 in-kernel (portable MXU
    path on v5e/v6e/v7x, 1 byte/elem HBM traffic).  The epilogue (dinv post-scale,
    bias, optional ReLU, optional 0/1 dropout-mask multiply, optional fused @W2 of
    the next layer followed by the next layer's dinv pre-scale) runs once per
    output row-block at k == last; the reduction accumulates in an f32 VMEM
    scratch.
    """

    def kernel(*refs):
        adj_ref, xw_ref, b_ref, dinv_ref = refs[0], refs[1], refs[2], refs[3]
        idx = 4
        mask_ref = None
        w2_ref = None
        if has_mask:
            mask_ref = refs[idx]
            idx += 1
        if has_w2:
            w2_ref = refs[idx]
            idx += 1
        out_ref, acc_ref = refs[idx], refs[idx + 1]

        k = pl.program_id(1)

        @pl.when(k == 0)
        def _init():
            acc_ref[...] = jnp.zeros_like(acc_ref)

        # int8 0/1 tile -> bf16 for the MXU (cast is VPU work, hidden under the DMA)
        adj_bf16 = adj_ref[...].astype(jnp.float32).astype(jnp.bfloat16)
        acc_ref[...] += jnp.dot(
            adj_bf16, xw_ref[...], preferred_element_type=jnp.float32
        )

        @pl.when(k == pl.num_programs(1) - 1)
        def _epilogue():
            h = acc_ref[...] * dinv_ref[...] + b_ref[...]
            if apply_relu:
                h = jnp.maximum(h, 0.0)
            if has_mask:
                h = h * mask_ref[...].astype(jnp.float32)
            if has_w2:
                h = jnp.dot(
                    h.astype(jnp.bfloat16), w2_ref[...],
                    preferred_element_type=jnp.float32,
                )
                h = h * dinv_ref[...]        # pre-scale for the next aggregation
            out_ref[...] = h.astype(out_ref.dtype)

    return kernel


# ------------------------------------------------------------------------- glue
def binary_adjacency_and_dinv(edge_index, num_nodes):
    # TODO(synk): the sparse scatter (edge_index -> dense adjacency, PyG's gcn_norm)
    # has no clean tiled Pallas equivalent; it stays plain-JAX glue and should be
    # cached across forward passes.  The dense N x N formulation is also the
    # scalability limit for very large graphs.
    src, dst = edge_index[0], edge_index[1]
    a = jnp.zeros((num_nodes, num_nodes), jnp.float32)
    a = a.at[dst, src].set(1.0)
    a = jnp.maximum(a, a.T)                                      # undirected
    a = jnp.maximum(a, jnp.eye(num_nodes, dtype=jnp.float32))    # add self loops
    deg = a.sum(axis=1)
    dinv = jax.lax.rsqrt(deg)
    return a, dinv


def make_dropout_mask(key, p, shape):
    """0/1 keep-mask (f32); the 1/(1-p) inverted-dropout scale is folded into W2."""
    if p >= 1.0:
        return jnp.zeros(shape, jnp.float32)
    return jax.random.bernoulli(key, 1.0 - p, shape).astype(jnp.float32)


def gcn_forward(x, edge_index, params, *, training=False, dropout_p=0.5,
                dropout_key=None, dropout_mask=None):
    """2-layer GCN forward (same semantics as the PyTorch module):
         h   = relu(A_hat @ (x @ W1) + b1)
         h   = dropout(h, p)            # training only (inverted dropout)
         out = A_hat @ (h @ W2) + b2
       with A_hat = D^{-1/2} (A + I) D^{-1/2} factored as an exact int8 binary
       stream plus f32 per-row dinv scaling.
    """
    w1, b1, w2, b2 = params
    n, fin = x.shape
    hid = w1.shape[1]
    fout = w2.shape[1]

    # pad everything to lane/sublane-friendly multiples of 128
    n_p = _round_up(n, 128)
    fin_p = _round_up(fin, 128)
    hid_p = _round_up(hid, 128)
    fout_p = _round_up(fout, 128)

    use_mask = bool(training) and dropout_p > 0.0
    budget, vmem_limit = _vmem_budget_and_limit()
    tm, tk = _select_tiles(n_p, hid_p, fout_p, budget, use_mask)

    params_1d = pltpu.CompilerParams(
        dimension_semantics=("parallel",), vmem_limit_bytes=vmem_limit)
    params_2d = pltpu.CompilerParams(
        dimension_semantics=("parallel", "arbitrary"), vmem_limit_bytes=vmem_limit)

    a_bin, dinv = binary_adjacency_and_dinv(edge_index, n)
    adj_p = _pad2(a_bin, n_p, n_p).astype(jnp.int8)          # exact 0/1, 1 byte/elem
    dinv_p = _pad2(dinv.reshape(-1, 1), n_p, 1).astype(jnp.float32)

    x_p = _pad2(x, n_p, fin_p).astype(jnp.bfloat16)
    w1_p = _pad2(w1, fin_p, hid_p).astype(jnp.bfloat16)
    b1_p = _pad2(b1.reshape(1, -1), 1, hid_p).astype(jnp.float32)
    b2_p = _pad2(b2.reshape(1, -1), 1, fout_p).astype(jnp.float32)

    # fold the 1/(1-p) inverted-dropout scale into W2 so the mask stays exact 0/1
    w2_eff = w2 / (1.0 - dropout_p) if use_mask else w2
    w2_p = _pad2(w2_eff, hid_p, fout_p).astype(jnp.bfloat16)

    mask_p = None
    if use_mask:
        if dropout_mask is None:
            if dropout_key is None:
                raise ValueError(
                    "training=True with dropout_p > 0 requires dropout_key or an "
                    "explicit 0/1 dropout_mask (no silent PRNGKey(0) fallback).")
            dropout_mask = make_dropout_mask(dropout_key, dropout_p, (n, hid))
        mask_p = _pad2(dropout_mask.astype(jnp.bfloat16), n_p, hid_p)

    # ---- stage 1: xw1s = dinv * (x @ W1)  (W1 resident, lane-dense output) --------
    # TODO(synk): for large graphs this stage could be fused into stage 2 (recompute
    # the (tk, hid) block from an x tile) to avoid the xw1 HBM round-trip.
    xw1s = pl.pallas_call(
        feature_transform_kernel,
        out_shape=jax.ShapeDtypeStruct((n_p, hid_p), jnp.bfloat16),
        grid=(n_p // tm,),
        in_specs=[
            pl.BlockSpec((tm, fin_p), lambda i: (i, 0)),
            pl.BlockSpec((fin_p, hid_p), lambda i: (0, 0)),
            pl.BlockSpec((tm, 1), lambda i: (i, 0)),
        ],
        out_specs=pl.BlockSpec((tm, hid_p), lambda i: (i, 0)),
        compiler_params=params_1d,
    )(x_p, w1_p, dinv_p)

    # ---- stage 2: hw2s = dinv * ((dropout(relu(dinv*(A_bin @ xw1s) + b1))) @ W2') --
    agg_inputs = [adj_p, xw1s, b1_p, dinv_p]
    agg_specs = [
        pl.BlockSpec((tm, tk), lambda i, k: (i, k)),      # int8 adj tile (streamed)
        pl.BlockSpec((tk, hid_p), lambda i, k: (k, 0)),   # xw1s tile (streamed over k)
        pl.BlockSpec((1, hid_p), lambda i, k: (0, 0)),    # bias (resident)
        pl.BlockSpec((tm, 1), lambda i, k: (i, 0)),       # dinv row block
    ]
    if use_mask:
        agg_inputs.append(mask_p)
        agg_specs.append(pl.BlockSpec((tm, hid_p), lambda i, k: (i, 0)))
    agg_inputs.append(w2_p)
    agg_specs.append(pl.BlockSpec((hid_p, fout_p), lambda i, k: (0, 0)))  # W2 resident

    hw2s = pl.pallas_call(
        make_aggregate_kernel(apply_relu=True, has_mask=use_mask, has_w2=True),
        out_shape=jax.ShapeDtypeStruct((n_p, fout_p), jnp.bfloat16),
        grid=(n_p // tm, n_p // tk),
        in_specs=agg_specs,
        out_specs=pl.BlockSpec((tm, fout_p), lambda i, k: (i, 0)),
        scratch_shapes=[pltpu.VMEM((tm, hid_p), jnp.float32)],
        compiler_params=params_2d,
    )(*agg_inputs)

    # ---- stage 3: out = dinv * (A_bin @ hw2s) + b2 ---------------------------------
    out_p = pl.pallas_call(
        make_aggregate_kernel(apply_relu=False, has_mask=False, has_w2=False),
        out_shape=jax.ShapeDtypeStruct((n_p, fout_p), jnp.float32),
        grid=(n_p // tm, n_p // tk),
        in_specs=[
            pl.BlockSpec((tm, tk), lambda i, k: (i, k)),
            pl.BlockSpec((tk, fout_p), lambda i, k: (k, 0)),
            pl.BlockSpec((1, fout_p), lambda i, k: (0, 0)),
            pl.BlockSpec((tm, 1), lambda i, k: (i, 0)),
        ],
        out_specs=pl.BlockSpec((tm, fout_p), lambda i, k: (i, 0)),
        scratch_shapes=[pltpu.VMEM((tm, fout_p), jnp.float32)],
        compiler_params=params_2d,
    )(adj_p, hw2s, b2_p, dinv_p)

    return out_p[:n, :fout]


def gcn_reference(x, adj_hat, params):
    w1, b1, w2, b2 = params
    h = jnp.maximum(adj_hat @ (x @ w1) + b1, 0.0)
    return adj_hat @ (h @ w2) + b2


if __name__ == "__main__":
    key = jax.random.PRNGKey(0)
    N, E = 64, 200
    in_feats, hidden_feats, out_feats = 16, 32, 8

    k_edge, k_x, k_w1, k_b1, k_w2, k_b2, k_drop = jax.random.split(key, 7)
    edge_index = jax.random.randint(k_edge, (2, E), 0, N, dtype=jnp.int32)
    x = jax.random.normal(k_x, (N, in_feats), dtype=jnp.float32)

    def glorot(k, shape):
        lim = float(np.sqrt(6.0 / (shape[0] + shape[1])))
        return jax.random.uniform(k, shape, jnp.float32, -lim, lim)

    w1 = glorot(k_w1, (in_feats, hidden_feats))
    b1 = 0.1 * jax.random.normal(k_b1, (hidden_feats,), dtype=jnp.float32)
    w2 = glorot(k_w2, (hidden_feats, out_feats))
    b2 = 0.1 * jax.random.normal(k_b2, (out_feats,), dtype=jnp.float32)
    params = (w1, b1, w2, b2)

    a_bin, dinv = binary_adjacency_and_dinv(edge_index, N)
    adj_hat = a_bin * dinv[:, None] * dinv[None, :]

    # ---- eval mode (F.dropout is the identity): check vs. pure-JAX f32 reference ----
    out_eval = gcn_forward(x, edge_index, params, training=False)
    jax.block_until_ready(out_eval)
    ref_eval = gcn_reference(x, adj_hat, params)
    assert out_eval.shape == (N, out_feats)
    assert jnp.allclose(out_eval, ref_eval, atol=3e-2, rtol=3e-2), (
        f"eval mismatch, max abs err {float(jnp.max(jnp.abs(out_eval - ref_eval)))}"
    )

    # ---- training mode: deterministic explicit 0/1 dropout mask, checked end to end -
    p = 0.5
    mask01 = make_dropout_mask(k_drop, p, (N, hidden_feats))
    out_train = gcn_forward(x, edge_index, params, training=True,
                            dropout_p=p, dropout_mask=mask01)
    jax.block_until_ready(out_train)
    h_ref = jnp.maximum(adj_hat @ (x @ w1) + b1, 0.0) * mask01 / (1.0 - p)
    ref_train = adj_hat @ (h_ref @ w2) + b2
    assert out_train.shape == (N, out_feats)
    assert jnp.allclose(out_train, ref_train, atol=3e-2, rtol=3e-2), (
        f"train mismatch, max abs err {float(jnp.max(jnp.abs(out_train - ref_train)))}"
    )

    print("KERNEL_OK")
</pallas_src>

<mosaic_0001>
module attributes {stable_mosaic.version = 11 : i64} {
  func.func @feature_transform_kernel(%arg0: i32, %arg1: memref<128x128xbf16, #tpu.memory_space<vmem>>, %arg2: memref<128x128xbf16, #tpu.memory_space<vmem>>, %arg3: memref<128x1xf32, #tpu.memory_space<vmem>>, %arg4: memref<128x128xbf16, #tpu.memory_space<vmem>>) attributes {dimension_semantics = [#tpu.dimension_semantics<parallel>], iteration_bounds = array<i64: 1>, scalar_prefetch = 0 : i64, scratch_operands = 0 : i64, tpu.core_type = #tpu.core_type<tc>, window_params = [{transform_indices = @transform_0, window_bounds = array<i64: 128, 128>}, {pipeline_mode = #tpu.pipeline_mode<synchronous>, transform_indices = @transform_1, window_bounds = array<i64: 128, 128>}, {transform_indices = @transform_2, window_bounds = array<i64: 128, 1>}, {transform_indices = @transform_3, window_bounds = array<i64: 128, 128>}]} {
    %c0 = arith.constant 0 : index
    %c0_0 = arith.constant 0 : index
    %0 = vector.load %arg1[%c0, %c0_0] : memref<128x128xbf16, #tpu.memory_space<vmem>>, vector<128x128xbf16>
    %c0_1 = arith.constant 0 : index
    %c0_2 = arith.constant 0 : index
    %1 = vector.load %arg2[%c0_1, %c0_2] : memref<128x128xbf16, #tpu.memory_space<vmem>>, vector<128x128xbf16>
    %cst = arith.constant dense<0.000000e+00> : vector<128x128xf32>
    %2 = tpu.matmul %0, %1, %cst {dimension_numbers = #tpu.dot_dimension_numbers<[1], [0], [0], [1], [0, 0, 1, 1], [], []>} : vector<128x128xbf16>, vector<128x128xbf16>, vector<128x128xf32> -> vector<128x128xf32>
    %c0_3 = arith.constant 0 : index
    %c0_4 = arith.constant 0 : index
    %3 = vector.load %arg3[%c0_3, %c0_4] : memref<128x1xf32, #tpu.memory_space<vmem>>, vector<128x1xf32>
    %4 = vector.broadcast %3 : vector<128x1xf32> to vector<128x128xf32>
    %5 = arith.mulf %2, %4 : vector<128x128xf32>
    %6 = arith.truncf %5 : vector<128x128xf32> to vector<128x128xbf16>
    %c0_5 = arith.constant 0 : index
    %c0_6 = arith.constant 0 : index
    %7 = vector.load %arg4[%c0_5, %c0_6] : memref<128x128xbf16, #tpu.memory_space<vmem>>, vector<128x128xbf16>
    tpu.vector_store %arg4[%c0_5, %c0_6], %6 {strides = array<i32>} : memref<128x128xbf16, #tpu.memory_space<vmem>>, vector<128x128xbf16>,
    return
  }
  func.func @transform_0(%arg0: i32) -> (i32, i32) {
    %c0_i32 = arith.constant 0 : i32
    %c0_i32_0 = arith.constant 0 : i32
    return %arg0, %c0_i32 : i32, i32
  }
  func.func @transform_1(%arg0: i32) -> (i32, i32) {
    %c0_i32 = arith.constant 0 : i32
    %c0_i32_0 = arith.constant 0 : i32
    %c0_i32_1 = arith.constant 0 : i32
    return %c0_i32, %c0_i32_0 : i32, i32
  }
  func.func @transform_2(%arg0: i32) -> (i32, i32) {
    %c0_i32 = arith.constant 0 : i32
    %c0_i32_0 = arith.constant 0 : i32
    return %arg0, %c0_i32 : i32, i32
  }
  func.func @transform_3(%arg0: i32) -> (i32, i32) {
    %c0_i32 = arith.constant 0 : i32
    %c0_i32_0 = arith.constant 0 : i32
    return %arg0, %c0_i32 : i32, i32
  }
}

</mosaic_0001>

<bundles_post_ra>
// kernel: tpu_custom_call.1
= control target key start
LH: loop header
LB: loop body
LE: loop exit
PB: predicated region body
PF: predicated region fallthrough
CT: control target
= control target key end

     0   :  { %v654_v2 = vmov 0   ;;  %s786_s0 = inlined_call_operand.vmem [shape: bf16[128,128], index: 0, kind: input, shape index: {}]   ;;  %s787_s1 = inlined_call_operand.vmem [shape: bf16[128,128], index: 1, kind: input, shape index: {}]   ;;  %s788_s2 = inlined_call_operand.vmem [shape: f32[128,1], index: 2, kind: input, shape index: {}]   ;;  %s789_s3 = inlined_call_operand.hbm [shape: bf16[128,128], index: 3, kind: output, shape index: {}]  }
   0x1   :  { %v614_v0 = vld [vmem:[%s787_s1] sm:$0xff]   ;;  %v615_v1 = vld [vmem:[%s787_s1 + $0x8] sm:$0xff]   ;;  %613 = vset.pattern.permute.xlu1 %v654_v2  ;;  %612 = vset.pattern.permute.xlu0 %v654_v2  ;;  %v616_v3 = vld [vmem:[%s787_s1 + $0x10] sm:$0xff]  }
   0x2   :  { %560 = vmatprep.subr.bf16.mxu0 %v614_v0  ;;  %592 = vmatprep.subr.bf16.mxu1 %v614_v0  ;;  %v617_v4 = vld [vmem:[%s787_s1 + $0x18] sm:$0xff]   ;;  %v622_v5 = vld [vmem:[%s786_s0] sm:$0xff]   ;;  %v619_v8 = vld [vmem:[%s787_s1 + $0x28] sm:$0xff]  }
   0x3   :  { %561 = vmatpush3.bf16.msra.mxu0 %v614_v0  ;;  %600 = vmatpush3.bf16.msra.mxu1 %v614_v0  ;;  %v623_v6 = vld [vmem:[%s786_s0 + $0x20] sm:$0xff]   ;;  %v243_v9 = vld [vmem:[%s788_s2 + $0x10] sm:$0xff]  ;;  %v244_v11 = vld [vmem:[%s788_s2 + $0x18] sm:$0xff] }
   0x4   :  { %562 = vmatprep.subr.bf16.mxu0 %v615_v1  ;;  %593 = vmatprep.subr.bf16.mxu1 %v615_v1  ;;  %v618_v7 = vld [vmem:[%s787_s1 + $0x20] sm:$0xff]   ;;  %v242_v12 = vld [vmem:[%s788_s2 + $0x8] sm:$0xff]  ;;  %v620_v13 = vld [vmem:[%s787_s1 + $0x30] sm:$0xff]  }
   0x5   :  { %576 = vmatprep.mubr.bf16.mxu0 %v622_v5  ;;  %584 = vmatprep.mubr.bf16.mxu1 %v623_v6  ;;  %v241_v10 = vld [vmem:[%s788_s2] sm:$0xff] }
   0x6   :  { %269 = vperm.xlu1 %613, %v243_v9   ;;  %259 = vperm.xlu0 %612, %v241_v10  }
   0x7   :  { %563 = vmatpush3.bf16.msra.mxu0 %v615_v1  ;;  %601 = vmatpush3.bf16.msra.mxu1 %v615_v1 }
   0x8   :  { %564 = vmatprep.subr.bf16.mxu0 %v616_v3  ;;  %594 = vmatprep.subr.bf16.mxu1 %v616_v3 }
   0xa   :  { %274 = vperm.xlu1 %613, %v244_v11   ;;  %264 = vperm.xlu0 %612, %v242_v12  }
   0xb   :  { %565 = vmatpush3.bf16.msra.mxu0 %v616_v3  ;;  %602 = vmatpush3.bf16.msra.mxu1 %v616_v3 }
   0xc   :  { %566 = vmatprep.subr.bf16.mxu0 %v617_v4  ;;  %595 = vmatprep.subr.bf16.mxu1 %v617_v4 }
   0xf   :  { %567 = vmatpush3.bf16.msra.mxu0 %v617_v4  ;;  %603 = vmatpush3.bf16.msra.mxu1 %v617_v4 }
  0x10   :  { %568 = vmatprep.subr.bf16.mxu0 %v618_v7  ;;  %596 = vmatprep.subr.bf16.mxu1 %v618_v7 }
  0x13   :  { %569 = vmatpush3.bf16.msra.mxu0 %v618_v7  ;;  %604 = vmatpush3.bf16.msra.mxu1 %v618_v7 }
  0x14   :  { %570 = vmatprep.subr.bf16.mxu0 %v619_v8  ;;  %597 = vmatprep.subr.bf16.mxu1 %v619_v8 }
  0x15   :  { %8 = vsyncpa [#allocation3], 0  ;;  %v246_v14 = vld [vmem:[%s788_s2 + $0x28] sm:$0xff]  ;;  %v245_v15 = vld [vmem:[%s788_s2 + $0x20] sm:$0xff] }
  0x16   :  { %v621_v16 = vld [vmem:[%s787_s1 + $0x38] sm:$0xff]   ;;  %284 = vperm.xlu1 %613, %v246_v14   ;;  %279 = vperm.xlu0 %612, %v245_v15   ;;  %v247_v18 = vld [vmem:[%s788_s2 + $0x30] sm:$0xff]  ;;  %v624_v19 = vld [vmem:[%s786_s0 + $0x8] sm:$0xff]  }
  0x17   :  { %571 = vmatpush3.bf16.msra.mxu0 %v619_v8  ;;  %605 = vmatpush3.bf16.msra.mxu1 %v619_v8  ;;  %v248_v17 = vld [vmem:[%s788_s2 + $0x38] sm:$0xff]  ;;  %v625_v20 = vld [vmem:[%s786_s0 + $0x28] sm:$0xff]   ;;  %v249_v22 = vld [vmem:[%s788_s2 + $0x40] sm:$0xff] }
  0x18   :  { %572 = vmatprep.subr.bf16.mxu0 %v620_v13  ;;  %598 = vmatprep.subr.bf16.mxu1 %v620_v13  ;;  %v250_v21 = vld [vmem:[%s788_s2 + $0x48] sm:$0xff]  ;;  %v626_v23 = vld [vmem:[%s786_s0 + $0x10] sm:$0xff]   ;;  %v252_v25 = vld [vmem:[%s788_s2 + $0x58] sm:$0xff] }
  0x19   :  { %v627_v24 = vld [vmem:[%s786_s0 + $0x30] sm:$0xff]   ;;  %v628_v27 = vld [vmem:[%s786_s0 + $0x18] sm:$0xff]   ;;  %v254_v29 = vld [vmem:[%s788_s2 + $0x68] sm:$0xff] }
  0x1a   :  { %294 = vperm.xlu1 %613, %v248_v17   ;;  %289 = vperm.xlu0 %612, %v247_v18   ;;  %v251_v26 = vld [vmem:[%s788_s2 + $0x50] sm:$0xff]  ;;  %v629_v28 = vld [vmem:[%s786_s0 + $0x38] sm:$0xff]   ;;  %v253_v30 = vld [vmem:[%s788_s2 + $0x60] sm:$0xff]  ;;  %s655_s0 = smov [#allocation2]  }
  0x1b   :  { %573 = vmatpush3.bf16.msra.mxu0 %v620_v13  ;;  %606 = vmatpush3.bf16.msra.mxu1 %v620_v13  ;;  %v256_v31 = vld [vmem:[%s788_s2 + $0x78] sm:$0xff]  ;;  %v255_v32 = vld [vmem:[%s788_s2 + $0x70] sm:$0xff]  ;;  %s438_s2 = sshll.u32 %s655_s0, 4  ;;  %s439_s2 = int_to_ptr.vmem [resolvable:$true] %s438_s2 }
  0x1c   :  { %574 = vmatprep.subr.bf16.mxu0 %v621_v16  ;;  %599 = vmatprep.subr.bf16.mxu1 %v621_v16  ;;  %s630_s21 = scalar_lea.vmem %s439_s2, 1024  ;;  %p635_p1 = scmp.lt.s32.totalorder %s439_s2, %s439_s2 }
  0x1d   :  { %p631_p0 = scmp.ne.s32.totalorder %s439_s2, %s630_s21  ;;  %p636_p2 = scmp.lt.s32.totalorder %s630_s21, %s630_s21 }
  0x1e   :  { %304 = vperm.xlu1 %613, %v250_v21   ;;  %299 = vperm.xlu0 %612, %v249_v22  }
  0x1f   :  { %575 = vmatpush3.bf16.msra.mxu0 %v621_v16  ;;  %607 = vmatpush3.bf16.msra.mxu1 %v621_v16  ;;  %p637_p3 = por %p636_p2, %p635_p1 }
  0x21   :  { %p638_p4 = pnand %p637_p3, %p631_p0 }
  0x22   :  { %577 = vmatmul.mubr.bf16.vlgmr.msra.gmra.mrb[0].mxu0 %v624_v19  ;;  %585 = vmatmul.mubr.bf16.vlgmr.msra.gmra.mrb[0].mxu1 %v625_v20 }
  0x23   :  { %580 = vmatprep.mubr.bf16.mxu0 %v626_v23  ;;  %588 = vmatprep.mubr.bf16.mxu1 %v627_v24 }
  0x24   :  { %314 = vperm.xlu1 %613, %v252_v25   ;;  %309 = vperm.xlu0 %612, %v251_v26  }
  0x28   :  { %324 = vperm.xlu1 %613, %v254_v29   ;;  %319 = vperm.xlu0 %612, %v253_v30  }
  0x2a   :  { %581 = vmatmul.mubr.bf16.gmra.mrb[4].mxu0 %v628_v27  ;;  %589 = vmatmul.mubr.bf16.gmra.mrb[4].mxu1 %v629_v28 }
  0x2c   :  { %334 = vperm.xlu1 %613, %v256_v31   ;;  %329 = vperm.xlu0 %612, %v255_v32  }
  0x85   :  { %v270_v33 = vpop.permute.xlu1 %269  ;;  %v260_v34 = vpop.permute.xlu0 %259 }
  0x89   :  { %v275_v35 = vpop.permute.xlu1 %274  ;;  %v265_v36 = vpop.permute.xlu0 %264 }
  0x95   :  { %v285_v37 = vpop.permute.xlu1 %284  ;;  %v280_v38 = vpop.permute.xlu0 %279 }
  0x99   :  { %v295_v39 = vpop.permute.xlu1 %294  ;;  %v290_v40 = vpop.permute.xlu0 %289 }
  0x9d   :  { %v305_v41 = vpop.permute.xlu1 %304  ;;  %v300_v42 = vpop.permute.xlu0 %299 }
  0xa3   :  { %v315_v43 = vpop.permute.xlu1 %314  ;;  %v310_v44 = vpop.permute.xlu0 %309 }
  0xa7   :  { %v325_v45 = vpop.permute.xlu1 %324  ;;  %v320_v46 = vpop.permute.xlu0 %319 }
  0xab   :  { %v335_v3 = vpop.permute.xlu1 %334  ;;  %v330_v4 = vpop.permute.xlu0 %329 }
  0xf5   :  { %v578_v47 = vpop.f32.mrb[0].mxu0  ;;  %v586_v48 = vpop.f32.mrb[0].mxu1 }
  0xf6   :  { %v178_v49 = vpop.f32.mrb[1].mxu0  ;;  %v210_v50 = vpop.f32.mrb[1].mxu1  ;;  %v339_v53 = vmul.f32 %v578_v47, %v270_v33  ;;  %v347_v54 = vmul.f32 %v586_v48, %v310_v44 }
  0xf7   :  { %v579_v51 = vpop.f32.mrb[2].mxu0  ;;  %v587_v52 = vpop.f32.mrb[2].mxu1  ;;  %v337_v59 = vmul.f32 %v260_v34, %v178_v49  ;;  %v345_v60 = vmul.f32 %v300_v42, %v210_v50 }
  0xf8   :  { %v340_v55 = vmul.f32 %v579_v51, %v275_v35  ;;  %v348_v56 = vmul.f32 %v587_v52, %v315_v43  ;;  %v181_v57 = vpop.f32.mrb[3].mxu0  ;;  %v213_v58 = vpop.f32.mrb[3].mxu1 }
  0xf9   :  { %v338_v61 = vmul.f32 %v265_v36, %v181_v57  ;;  %v346_v62 = vmul.f32 %v305_v41, %v213_v58 }
  0xfa   :  { %v505_v63 = vpack.c.bf16 %v340_v55, %v339_v53  ;;  %v525_v0 = vpack.c.bf16 %v348_v56, %v347_v54 }
  0xfb   :  { %v500_v1 = vpack.c.bf16 %v338_v61, %v337_v59  ;;  %v520_v2 = vpack.c.bf16 %v346_v62, %v345_v60 }
  0xfc   :  { %537 = vst [vmem:[#allocation2 + $0x8] sm:$0xff] %v505_v63   ;;  %541 = vst [vmem:[#allocation2 + $0x28] sm:$0xff] %v525_v0  }
  0xfd   :  { %501 = vst [vmem:[#allocation2] sm:$0xff] %v500_v1   ;;  %540 = vst [vmem:[#allocation2 + $0x20] sm:$0xff] %v520_v2   ;;  %v582_v5 = vpop.f32.mrb[4].mxu0  ;;  %v590_v6 = vpop.f32.mrb[4].mxu1 }
  0xfe   :  { %v194_v7 = vpop.f32.mrb[5].mxu0  ;;  %v226_v8 = vpop.f32.mrb[5].mxu1  ;;  %v343_v11 = vmul.f32 %v582_v5, %v290_v40  ;;  %v351_v12 = vmul.f32 %v590_v6, %v330_v4 }
  0xff   :  { %v583_v9 = vpop.f32.mrb[6].mxu0  ;;  %v591_v10 = vpop.f32.mrb[6].mxu1  ;;  %v341_v17 = vmul.f32 %v280_v38, %v194_v7  ;;  %v349_v18 = vmul.f32 %v320_v46, %v226_v8 }
 0x100   :  { %v344_v13 = vmul.f32 %v583_v9, %v295_v39  ;;  %v352_v14 = vmul.f32 %v591_v10, %v335_v3  ;;  %v197_v15 = vpop.f32.mrb[7].mxu0  ;;  %v229_v16 = vpop.f32.mrb[7].mxu1 }
 0x101   :  { %v342_v19 = vmul.f32 %v285_v37, %v197_v15  ;;  %v350_v20 = vmul.f32 %v325_v45, %v229_v16 }
 0x102   :  { %v515_v21 = vpack.c.bf16 %v344_v13, %v343_v11  ;;  %v535_v22 = vpack.c.bf16 %v352_v14, %v351_v12 }
 0x103   :  { %v510_v23 = vpack.c.bf16 %v342_v19, %v341_v17  ;;  %v530_v24 = vpack.c.bf16 %v350_v20, %v349_v18 }
 0x104   :  { %539 = vst [vmem:[#allocation2 + $0x18] sm:$0xff] %v515_v21   ;;  %543 = vst [vmem:[#allocation2 + $0x38] sm:$0xff] %v535_v22  }
 0x105   :  { %538 = vst [vmem:[#allocation2 + $0x10] sm:$0xff] %v510_v23   ;;  %542 = vst [vmem:[#allocation2 + $0x30] sm:$0xff] %v530_v24  }
 0x106   :  { %641 = shalt.err (!%p638_p4)
}
 0x107   :  { %s642_s23 = scalar_lea.hbm %s789_s3, 1024 }
 0x108   :  { %p643_p5 = scmp.ne.s32.totalorder %s789_s3, %s642_s23  ;;  %p646_p6 = scmp.lt.u32.totalorder %s642_s23, %s789_s3 }
 0x10a   :  { %p648_p7 = pnand %p646_p6, %p643_p5 }
 0x10c   :  { %651 = shalt.err (!%p648_p7)
}
 0x10d   :  { %s656_s28 = smov 64   ;;  %s657_s29 = smov 4  }
 0x10e   :  { %444 = dma.vmem_to_hbm [thread:$0]  %s439_s2, 1024, %s789_s3, [#allocation3], %s656_s28, %s656_s28, %s657_s29  }
 0x10f   :  { %652 = dma.done.wait [#allocation3], 1024  }
 0x110   :  { %653 = vsyncadd [#allocation3], 4294966272 }
 0x111   :  { %448 = vsyncpa [#allocation3], 1 }

</bundles_post_ra>
